<compile_context>
chip_gen: v7x
topology: tpu7x:2x2x1
jax: 0.10.0
libtpu: 0.0.40
codegen_flags: <defaults>
</compile_context>

<pallas_src>
import functools

import numpy as np
import jax
import jax.numpy as jnp
from jax import lax
from jax.experimental import pallas as pl
from jax.experimental.pallas import tpu as pltpu


def _round_up(x, m):
    return (x + m - 1) // m * m


def _to(arr, dtype):
    """Cast only when needed (avoids dead converts / extra VMEM copies)."""
    return arr if arr.dtype == dtype else arr.astype(dtype)


# --------------------------------------------------------------------------- #
# Kernels
# --------------------------------------------------------------------------- #
def _nl_kernel_single(cip, mdt, hw_real, needs_mask,
                      x_ref,      # (1, C, HWp)  act dtype
                      wcat_ref,   # (3*Ci, C)    mdt   rows = [theta; phi; g]
                      bcat_ref,   # (3*Ci, 1)    f32
                      wwf_ref,    # (C, Ci)      f32   (BN scale and 1/HW folded)
                      bwf_ref,    # (C, 1)       f32   (BN shift folded)
                      o_ref):     # (1, C, HWp)
    """One batch element per grid step; full (C, HWp) slab resident in VMEM."""
    x = x_ref[0]                                              # (C, HWp)
    xm = _to(x, mdt)

    # Fused theta/phi/g 1x1 convs: one (3Ci, C) @ (C, HW) MXU pass with f32
    # accumulation, then a SINGLE cast of the whole proj buffer to mdt.
    proj = jnp.dot(wcat_ref[...], xm,
                   preferred_element_type=jnp.float32) + bcat_ref[...]
    projm = _to(proj, mdt)                                    # (3Ci, HWp)
    theta = projm[0:cip]
    phi = projm[cip:2 * cip]
    g = projm[2 * cip:3 * cip]
    if needs_mask:  # HW was zero-padded: padded tokens carry the bias -> mask g.
        col = lax.broadcasted_iota(jnp.int32, (1, g.shape[-1]), 1)
        g = jnp.where(col < hw_real, g, jnp.zeros_like(g))

    # A[i, j] = sum_n phi[i, n] * g[j, n]      (Ci, Ci)
    a = lax.dot_general(phi, g, (((1,), (1,)), ((), ())),
                        preferred_element_type=jnp.float32)
    # M = (ww * bn_scale / HW) @ A^T           (C, Ci), tiny, kept in f32
    m = lax.dot_general(wwf_ref[...], a, (((1,), (1,)), ((), ())),
                        preferred_element_type=jnp.float32)
    # W_y = M @ theta + b ;  z = x + W_y       lane-dense (C, HWp) store
    w_y = jnp.dot(_to(m, mdt), theta,
                  preferred_element_type=jnp.float32) + bwf_ref[...]
    o_ref[0] = (_to(x, jnp.float32) + w_y).astype(o_ref.dtype)


def _nl_kernel_tiled(cip, mdt, hw_real, needs_mask, thw,
                     x_ref, wcat_ref, bcat_ref, wwf_ref, bwf_ref, o_ref,
                     a_ref, m_ref):
    """Two-pass HW-tiled variant for large C*HW (caps VMEM at O(C * thw)).

    grid = (B, 2, HWp // thw).  Pass 0 streams (C, thw) tiles and accumulates
    A = phi @ g^T in VMEM scratch; pass 1 computes theta per tile and writes the
    output tile.  The fused projection is split by rows across the passes, so
    there is no recompute (same total MXU flops as the single-tile path).
    """
    p = pl.program_id(1)
    j = pl.program_id(2)
    x = x_ref[0]                                              # (C, thw)
    xm = _to(x, mdt)

    @pl.when((p == 0) & (j == 0))
    def _():
        a_ref[...] = jnp.zeros_like(a_ref)

    @pl.when(p == 0)
    def _():
        # phi & g rows only (tile-aligned slice: cip is a multiple of 16).
        pg = jnp.dot(wcat_ref[cip:3 * cip, :], xm,
                     preferred_element_type=jnp.float32) + bcat_ref[cip:3 * cip, :]
        pgm = _to(pg, mdt)
        phi = pgm[0:cip]
        g = pgm[cip:2 * cip]
        if needs_mask:
            col = j * thw + lax.broadcasted_iota(jnp.int32, (1, thw), 1)
            g = jnp.where(col < hw_real, g, jnp.zeros_like(g))
        a_ref[...] += lax.dot_general(phi, g, (((1,), (1,)), ((), ())),
                                      preferred_element_type=jnp.float32)

    @pl.when(p == 1)
    def _():
        @pl.when(j == 0)
        def _():
            m_ref[...] = lax.dot_general(wwf_ref[...], a_ref[...],
                                         (((1,), (1,)), ((), ())),
                                         preferred_element_type=jnp.float32)
        theta = _to(jnp.dot(wcat_ref[0:cip, :], xm,
                            preferred_element_type=jnp.float32)
                    + bcat_ref[0:cip, :], mdt)
        w_y = jnp.dot(_to(m_ref[...], mdt), theta,
                      preferred_element_type=jnp.float32) + bwf_ref[...]
        o_ref[0] = (_to(x, jnp.float32) + w_y).astype(o_ref.dtype)


# --------------------------------------------------------------------------- #
# Wrapper
# --------------------------------------------------------------------------- #
def _device_vmem_capacity_bytes():
    try:
        return int(pltpu.get_tpu_info().vmem_capacity_bytes)
    except Exception:
        return 64 << 20   # safe lower bound across all TPU generations (v7x)


def _vmem_estimate(C, cip, hw_blk, act_bytes, m_bytes, tiled):
    """Realistic per-step VMEM footprint (blocks + in-kernel intermediates)."""
    io = 2 * 2 * C * hw_blk * act_bytes            # x & out blocks, double-buffered
    inter = 3 * cip * hw_blk * 4                   # proj (f32 accumulate)
    inter += C * hw_blk * 4                        # w_y (f32)
    if m_bytes != 4:
        inter += 3 * cip * hw_blk * m_bytes        # projm cast
        inter += C * hw_blk * m_bytes              # xm cast
    if act_bytes != 4:
        inter += C * hw_blk * 4                    # x -> f32 for the residual add
    # weights (conservatively assume double-buffered)
    weights = 2 * (3 * cip * C * m_bytes + 3 * cip * 4 + C * cip * 4 + C * 4)
    scratch = (cip * cip + C * cip) * 4 if tiled else 0
    return io + inter + weights + scratch + (8 << 20)   # compiler/pipeline headroom


def _fold_params(params, C, Ci, cip, HW, mdt):
    """Host-side folds (constant-folded by XLA)."""
    def pad(w, b):
        wp = jnp.zeros((cip, C), jnp.float32).at[:Ci].set(w.astype(jnp.float32))
        bp = jnp.zeros((cip,), jnp.float32).at[:Ci].set(b.astype(jnp.float32))
        return wp, bp

    wt, bt = pad(params["wt"], params["bt"])
    wp_, bp_ = pad(params["wp"], params["bp"])
    wg, bg = pad(params["wg"], params["bg"])
    wcat = jnp.concatenate([wt, wp_, wg], axis=0).astype(mdt)          # (3cip, C)
    bcat = jnp.concatenate([bt, bp_, bg], axis=0).reshape(3 * cip, 1)  # f32

    # Eval-mode BatchNorm folded into the W conv, plus the 1/HW of f_div_C.
    s = params["bn_gamma"] * lax.rsqrt(params["bn_var"] + 1e-5)        # (C,)
    wwf = jnp.zeros((C, cip), jnp.float32).at[:, :Ci].set(
        params["ww"].astype(jnp.float32) * s[:, None] / HW)
    bwf = ((params["bw"] - params["bn_mean"]) * s
           + params["bn_beta"]).reshape(C, 1).astype(jnp.float32)
    return wcat, bcat, wwf, bwf


def non_local_pallas(x_nchw, params, *, matmul_dtype=jnp.bfloat16,
                     activation_dtype=None, hw_tile=None):
    """x_nchw: (B, C, H, W). Returns (B, C, H, W) in the activation dtype.

    matmul_dtype:     MXU operand dtype (bf16 default; f32 only for validation).
    activation_dtype: dtype of the streamed (C, HW) activations (None -> x.dtype);
                      bf16 halves HBM traffic in the mem-bound regime, the
                      residual add is still done in f32 inside the kernel.
    hw_tile:          force the two-pass HW-tiled path with this tile size.
    """
    B, C, H, W = x_nchw.shape
    HW = H * W
    Ci = params["wg"].shape[0]
    mdt = np.dtype(matmul_dtype)
    adt = np.dtype(activation_dtype if activation_dtype is not None else x_nchw.dtype)

    cip = _round_up(max(Ci, 8), 16)   # keep proj slices (8,128)/bf16-pack aligned
    HWp = _round_up(HW, 128)          # lane-dense loads / unmasked stores
    needs_mask = HWp != HW

    x_tok = _to(x_nchw.reshape(B, C, HW), adt)
    if needs_mask:
        x_tok = jnp.pad(x_tok, ((0, 0), (0, 0), (0, HWp - HW)))

    wcat, bcat, wwf, bwf = _fold_params(params, C, Ci, cip, HW, mdt)

    act_bytes = adt.itemsize
    m_bytes = mdt.itemsize
    usable = int(_device_vmem_capacity_bytes() * 0.85)   # ~15% below physical VMEM

    # Pick: single full-HW slab if it fits, otherwise the two-pass HW-tiled path.
    if hw_tile is not None:
        thw = int(hw_tile)
        assert thw % 128 == 0 and HWp % thw == 0
        tiled = thw != HWp
    elif _vmem_estimate(C, cip, HWp, act_bytes, m_bytes, tiled=False) <= usable:
        thw, tiled = HWp, False
    else:
        thw, tiled = 128, True
        for n in range(1, HWp // 128 + 1):
            cand = HWp // n
            if HWp % n == 0 and cand % 128 == 0 and \
               _vmem_estimate(C, cip, cand, act_bytes, m_bytes, tiled=True) <= usable:
                thw = cand
                break

    est = _vmem_estimate(C, cip, thw, act_bytes, m_bytes, tiled)
    vmem_limit = int(min(usable, max(est, 32 << 20)))

    flops = 2 * B * HWp * (3 * cip * C + cip * cip + C * cip) + 2 * B * C * cip * cip
    x_reads = 2 if tiled else 1
    bytes_accessed = (B * C * HWp * act_bytes * (1 + x_reads)
                      + 3 * cip * (C * m_bytes + 4) + C * (cip + 1) * 4)
    cost = pl.CostEstimate(flops=int(flops), transcendentals=0,
                           bytes_accessed=int(bytes_accessed))

    def run(single_buffer_weights):
        wkw = {}
        if single_buffer_weights and hasattr(pl, "Buffered"):
            # Constant index maps -> never re-DMA'd; one buffer is enough.
            wkw = dict(pipeline_mode=pl.Buffered(1))

        if not tiled:
            grid = (B,)
            x_map = lambda b: (b, 0, 0)
            w_map = lambda b: (0, 0)
            o_map = x_map
            blk = (1, C, HWp)
            kernel = functools.partial(_nl_kernel_single, cip, mdt, HW, needs_mask)
            scratch = ()
            dims = ("parallel",)
        else:
            grid = (B, 2, HWp // thw)
            x_map = lambda b, p, j: (b, 0, j)
            w_map = lambda b, p, j: (0, 0)
            # Pass 0 parks the (never-written) output buffer on chunk 0; it is
            # only written back after pass 1 fully writes it -> no garbage stores.
            o_map = lambda b, p, j: (b, 0, j * p)
            blk = (1, C, thw)
            kernel = functools.partial(_nl_kernel_tiled, cip, mdt, HW, needs_mask, thw)
            scratch = (pltpu.VMEM((cip, cip), jnp.float32),   # A accumulator
                       pltpu.VMEM((C, cip), jnp.float32))     # M = wwf @ A^T
            # TODO(synk): for B == 1 on v7x (2 TensorCores) pass 1 could be split
            # over cores along HW (duplicating only the tiny A/M compute); as
            # written a B=1 tiled call uses one core.
            dims = ("parallel", "arbitrary", "arbitrary")

        return pl.pallas_call(
            kernel,
            out_shape=jax.ShapeDtypeStruct((B, C, HWp), adt),
            grid_spec=pltpu.PrefetchScalarGridSpec(
                num_scalar_prefetch=0,
                grid=grid,
                in_specs=[
                    pl.BlockSpec(blk, x_map),                      # activations
                    pl.BlockSpec((3 * cip, C), w_map, **wkw),      # fused proj W
                    pl.BlockSpec((3 * cip, 1), w_map, **wkw),      # fused proj b
                    pl.BlockSpec((C, cip), w_map, **wkw),          # W conv (BN+1/HW)
                    pl.BlockSpec((C, 1), w_map, **wkw),            # W bias (BN)
                ],
                out_specs=pl.BlockSpec(blk, o_map),
                scratch_shapes=scratch,
            ),
            compiler_params=pltpu.CompilerParams(
                dimension_semantics=dims,
                vmem_limit_bytes=vmem_limit),
            cost_estimate=cost,
        )(x_tok, wcat, bcat, wwf, bwf)

    try:
        out = run(single_buffer_weights=True)
    except Exception:
        # pl.Buffered(1) unsupported by this JAX build -> default double-buffered
        # weights (small VMEM cost only).
        out = run(single_buffer_weights=False)

    return out[:, :, :HW].reshape(B, C, H, W)


# --------------------------------------------------------------------------- #
# Pure-JAX reference (mirrors the PyTorch forward exactly, materializes f)
# --------------------------------------------------------------------------- #
def non_local_reference(x_nchw, params):
    B, C, H, W = x_nchw.shape
    HW = H * W
    x = x_nchw.reshape(B, C, HW)

    g_x = jnp.einsum("ic,bcn->bni", params["wg"], x) + params["bg"]          # (B,HW,Ci)
    theta_x = jnp.einsum("ic,bcn->bni", params["wt"], x) + params["bt"]      # (B,HW,Ci)
    phi_x = jnp.einsum("ic,bcn->bin", params["wp"], x) + params["bp"][:, None]
    f = jnp.einsum("bni,bim->bnm", theta_x, phi_x)
    f_div_c = f / HW
    y = jnp.einsum("bnm,bmi->bni", f_div_c, g_x)                             # (B,HW,Ci)
    w_y = jnp.einsum("ci,bni->bcn", params["ww"], y) + params["bw"][:, None]
    inv_std = lax.rsqrt(params["bn_var"] + 1e-5)
    w_y = ((w_y - params["bn_mean"][:, None])
           * (params["bn_gamma"] * inv_std)[:, None]
           + params["bn_beta"][:, None])
    return (w_y + x).reshape(B, C, H, W)


def init_params(key, in_channels, reduc_ratio=2, bn_zero_init=True):
    ci = in_channels // reduc_ratio
    ks = jax.random.split(key, 12)

    def conv_init(kw, kb, out_c, in_c):
        bound = 1.0 / jnp.sqrt(in_c)
        w = jax.random.uniform(kw, (out_c, in_c), jnp.float32, -bound, bound)
        b = jax.random.uniform(kb, (out_c,), jnp.float32, -bound, bound)
        return w, b

    wg, bg = conv_init(ks[0], ks[1], ci, in_channels)
    wt, bt = conv_init(ks[2], ks[3], ci, in_channels)
    wp, bp = conv_init(ks[4], ks[5], ci, in_channels)
    ww, bw = conv_init(ks[6], ks[7], in_channels, ci)

    if bn_zero_init:
        # Faithful to the PyTorch __init__: BN weight=0, bias=0 (=> z == x).
        gamma = jnp.zeros((in_channels,), jnp.float32)
        beta = jnp.zeros((in_channels,), jnp.float32)
        mean = jnp.zeros((in_channels,), jnp.float32)
        var = jnp.ones((in_channels,), jnp.float32)
    else:
        gamma = jax.random.uniform(ks[8], (in_channels,), jnp.float32, 0.5, 1.5)
        beta = jax.random.normal(ks[9], (in_channels,), jnp.float32) * 0.1
        mean = jax.random.normal(ks[10], (in_channels,), jnp.float32) * 0.1
        var = jax.random.uniform(ks[11], (in_channels,), jnp.float32, 0.5, 1.5)

    return dict(wg=wg, bg=bg, wt=wt, bt=bt, wp=wp, bp=bp, ww=ww, bw=bw,
                bn_gamma=gamma, bn_beta=beta, bn_mean=mean, bn_var=var)


if __name__ == "__main__":
    key = jax.random.PRNGKey(0)
    k_x, k_p, k_x2 = jax.random.split(key, 3)

    # Ci = 4 -> exercises the Ci->16 row padding; HW = 256 is already lane aligned.
    B, C, H, W = 2, 8, 16, 16
    x = jax.random.normal(k_x, (B, C, H, W), jnp.float32)
    # PyTorch inits BN gamma/beta to 0 (W_y == 0, z == x) which would make the test
    # vacuous for the attention/W path -- so test with nonzero BN statistics.
    params = init_params(k_p, in_channels=C, reduc_ratio=2, bn_zero_init=False)
    ref = jax.block_until_ready(non_local_reference(x, params))

    def maxerr(a, b):
        return float(jnp.max(jnp.abs(a.astype(jnp.float32) - b)))

    # 1) exact-math path (f32 matmuls, f32 activations, single full-HW slab)
    o = jax.block_until_ready(non_local_pallas(x, params, matmul_dtype=jnp.float32))
    assert o.shape == (B, C, H, W)
    assert jnp.allclose(o, ref, atol=1e-3, rtol=1e-3), maxerr(o, ref)

    # 2) default fast path: bf16 MXU matmuls with f32 accumulation
    o = jax.block_until_ready(non_local_pallas(x, params))
    assert jnp.allclose(o, ref, atol=5e-2, rtol=5e-2), maxerr(o, ref)

    # 3) bf16 activations (halves HBM in/out traffic; residual added in f32)
    o = jax.block_until_ready(
        non_local_pallas(x, params, activation_dtype=jnp.bfloat16))
    assert jnp.allclose(o.astype(jnp.float32), ref, atol=1e-1, rtol=1e-1), maxerr(o, ref)

    # 4) forced two-pass HW-tiled path (the large-C*HW / v7x configuration)
    o = jax.block_until_ready(
        non_local_pallas(x, params, matmul_dtype=jnp.float32, hw_tile=128))
    assert jnp.allclose(o, ref, atol=1e-3, rtol=1e-3), maxerr(o, ref)

    # 5) non-lane-aligned spatial size (HW=144 -> padded to 256, masked A accum),
    #    both single-slab and tiled variants.
    H2 = W2 = 12
    x2 = jax.random.normal(k_x2, (B, C, H2, W2), jnp.float32)
    ref2 = jax.block_until_ready(non_local_reference(x2, params))
    o = jax.block_until_ready(non_local_pallas(x2, params, matmul_dtype=jnp.float32))
    assert jnp.allclose(o, ref2, atol=1e-3, rtol=1e-3), maxerr(o, ref2)
    o = jax.block_until_ready(
        non_local_pallas(x2, params, matmul_dtype=jnp.float32, hw_tile=128))
    assert jnp.allclose(o, ref2, atol=1e-3, rtol=1e-3), maxerr(o, ref2)

    print("KERNEL_OK")
</pallas_src>

<mosaic_0001>
module attributes {stable_mosaic.version = 11 : i64} {
  func.func @_nl_kernel_single(%arg0: i32, %arg1: memref<1x8x256xf32, #tpu.memory_space<vmem>>, %arg2: memref<48x8xf32, #tpu.memory_space<vmem>>, %arg3: memref<48x1xf32, #tpu.memory_space<vmem>>, %arg4: memref<8x16xf32, #tpu.memory_space<vmem>>, %arg5: memref<8x1xf32, #tpu.memory_space<vmem>>, %arg6: memref<1x8x256xf32, #tpu.memory_space<vmem>>) attributes {dimension_semantics = [#tpu.dimension_semantics<parallel>], iteration_bounds = array<i64: 2>, scalar_prefetch = 0 : i64, scratch_operands = 0 : i64, tpu.core_type = #tpu.core_type<tc>, window_params = [{transform_indices = @transform_0, window_bounds = array<i64: 1, 8, 256>}, {pipeline_mode = #tpu.pipeline_mode<synchronous>, transform_indices = @transform_1, window_bounds = array<i64: 48, 8>}, {pipeline_mode = #tpu.pipeline_mode<synchronous>, transform_indices = @transform_2, window_bounds = array<i64: 48, 1>}, {pipeline_mode = #tpu.pipeline_mode<synchronous>, transform_indices = @transform_3, window_bounds = array<i64: 8, 16>}, {pipeline_mode = #tpu.pipeline_mode<synchronous>, transform_indices = @transform_4, window_bounds = array<i64: 8, 1>}, {transform_indices = @transform_5, window_bounds = array<i64: 1, 8, 256>}]} {
    %c0 = arith.constant 0 : index
    %c0_0 = arith.constant 0 : index
    %c0_1 = arith.constant 0 : index
    %0 = vector.load %arg1[%c0, %c0_0, %c0_1] : memref<1x8x256xf32, #tpu.memory_space<vmem>>, vector<1x8x256xf32>
    %1 = vector.shape_cast %0 : vector<1x8x256xf32> to vector<8x256xf32>
    %c0_2 = arith.constant 0 : index
    %c0_3 = arith.constant 0 : index
    %2 = vector.load %arg2[%c0_2, %c0_3] : memref<48x8xf32, #tpu.memory_space<vmem>>, vector<48x8xf32>
    %cst = arith.constant dense<0.000000e+00> : vector<48x256xf32>
    %3 = tpu.matmul %2, %1, %cst {dimension_numbers = #tpu.dot_dimension_numbers<[1], [0], [0], [1], [0, 0, 1, 1], [], []>} : vector<48x8xf32>, vector<8x256xf32>, vector<48x256xf32> -> vector<48x256xf32>
    %c0_4 = arith.constant 0 : index
    %c0_5 = arith.constant 0 : index
    %4 = vector.load %arg3[%c0_4, %c0_5] : memref<48x1xf32, #tpu.memory_space<vmem>>, vector<48x1xf32>
    %5 = vector.broadcast %4 : vector<48x1xf32> to vector<48x256xf32>
    %6 = arith.addf %3, %5 : vector<48x256xf32>
    %7 = vector.extract_strided_slice %6 {offsets = [0, 0], sizes = [16, 256], strides = [1, 1]} : vector<48x256xf32> to vector<16x256xf32>
    %8 = vector.extract_strided_slice %6 {offsets = [16, 0], sizes = [16, 256], strides = [1, 1]} : vector<48x256xf32> to vector<16x256xf32>
    %9 = vector.extract_strided_slice %6 {offsets = [32, 0], sizes = [16, 256], strides = [1, 1]} : vector<48x256xf32> to vector<16x256xf32>
    %cst_6 = arith.constant dense<0.000000e+00> : vector<16x16xf32>
    %10 = tpu.matmul %8, %9, %cst_6 {dimension_numbers = #tpu.dot_dimension_numbers<[1], [1], [0], [0], [0, 0, 1, 0], [], []>} : vector<16x256xf32>, vector<16x256xf32>, vector<16x16xf32> -> vector<16x16xf32>
    %c0_7 = arith.constant 0 : index
    %c0_8 = arith.constant 0 : index
    %11 = vector.load %arg4[%c0_7, %c0_8] : memref<8x16xf32, #tpu.memory_space<vmem>>, vector<8x16xf32>
    %cst_9 = arith.constant dense<0.000000e+00> : vector<8x16xf32>
    %12 = tpu.matmul %11, %10, %cst_9 {dimension_numbers = #tpu.dot_dimension_numbers<[1], [1], [0], [0], [0, 0, 1, 0], [], []>} : vector<8x16xf32>, vector<16x16xf32>, vector<8x16xf32> -> vector<8x16xf32>
    %cst_10 = arith.constant dense<0.000000e+00> : vector<8x256xf32>
    %13 = tpu.matmul %12, %7, %cst_10 {dimension_numbers = #tpu.dot_dimension_numbers<[1], [0], [0], [1], [0, 0, 1, 1], [], []>} : vector<8x16xf32>, vector<16x256xf32>, vector<8x256xf32> -> vector<8x256xf32>
    %c0_11 = arith.constant 0 : index
    %c0_12 = arith.constant 0 : index
    %14 = vector.load %arg5[%c0_11, %c0_12] : memref<8x1xf32, #tpu.memory_space<vmem>>, vector<8x1xf32>
    %15 = vector.broadcast %14 : vector<8x1xf32> to vector<8x256xf32>
    %16 = arith.addf %13, %15 : vector<8x256xf32>
    %17 = arith.addf %1, %16 : vector<8x256xf32>
    %c0_13 = arith.constant 0 : index
    %c0_14 = arith.constant 0 : index
    %c0_15 = arith.constant 0 : index
    %18 = vector.load %arg6[%c0_13, %c0_14, %c0_15] : memref<1x8x256xf32, #tpu.memory_space<vmem>>, vector<1x8x256xf32>
    %19 = vector.shape_cast %18 : vector<1x8x256xf32> to vector<8x256xf32>
    %20 = vector.shape_cast %17 : vector<8x256xf32> to vector<1x8x256xf32>
    tpu.vector_store %arg6[%c0_13, %c0_14, %c0_15], %20 {strides = array<i32>} : memref<1x8x256xf32, #tpu.memory_space<vmem>>, vector<1x8x256xf32>,
    return
  }
  func.func @transform_0(%arg0: i32) -> (i32, i32, i32) {
    %c0_i32 = arith.constant 0 : i32
    %c0_i32_0 = arith.constant 0 : i32
    %c0_i32_1 = arith.constant 0 : i32
    return %arg0, %c0_i32, %c0_i32_0 : i32, i32, i32
  }
  func.func @transform_1(%arg0: i32) -> (i32, i32) {
    %c0_i32 = arith.constant 0 : i32
    %c0_i32_0 = arith.constant 0 : i32
    %c0_i32_1 = arith.constant 0 : i32
    return %c0_i32, %c0_i32_0 : i32, i32
  }
  func.func @transform_2(%arg0: i32) -> (i32, i32) {
    %c0_i32 = arith.constant 0 : i32
    %c0_i32_0 = arith.constant 0 : i32
    %c0_i32_1 = arith.constant 0 : i32
    return %c0_i32, %c0_i32_0 : i32, i32
  }
  func.func @transform_3(%arg0: i32) -> (i32, i32) {
    %c0_i32 = arith.constant 0 : i32
    %c0_i32_0 = arith.constant 0 : i32
    %c0_i32_1 = arith.constant 0 : i32
    return %c0_i32, %c0_i32_0 : i32, i32
  }
  func.func @transform_4(%arg0: i32) -> (i32, i32) {
    %c0_i32 = arith.constant 0 : i32
    %c0_i32_0 = arith.constant 0 : i32
    %c0_i32_1 = arith.constant 0 : i32
    return %c0_i32, %c0_i32_0 : i32, i32
  }
  func.func @transform_5(%arg0: i32) -> (i32, i32, i32) {
    %c0_i32 = arith.constant 0 : i32
    %c0_i32_0 = arith.constant 0 : i32
    %c0_i32_1 = arith.constant 0 : i32
    return %arg0, %c0_i32, %c0_i32_0 : i32, i32, i32
  }
}

module attributes {stable_mosaic.version = 11 : i64} {
  func.func @_nl_kernel_single(%arg0: i32, %arg1: memref<1x8x256xf32, #tpu.memory_space<vmem>>, %arg2: memref<48x8xf32, #tpu.memory_space<vmem>>, %arg3: memref<48x1xf32, #tpu.memory_space<vmem>>, %arg4: memref<8x16xf32, #tpu.memory_space<vmem>>, %arg5: memref<8x1xf32, #tpu.memory_space<vmem>>, %arg6: memref<1x8x256xf32, #tpu.memory_space<vmem>>) attributes {dimension_semantics = [#tpu.dimension_semantics<parallel>], iteration_bounds = array<i64: 2>, scalar_prefetch = 0 : i64, scratch_operands = 0 : i64, tpu.core_type = #tpu.core_type<tc>, window_params = [{transform_indices = @transform_0, window_bounds = array<i64: 1, 8, 256>}, {pipeline_mode = #tpu.pipeline_mode<synchronous>, transform_indices = @transform_1, window_bounds = array<i64: 48, 8>}, {pipeline_mode = #tpu.pipeline_mode<synchronous>, transform_indices = @transform_2, window_bounds = array<i64: 48, 1>}, {pipeline_mode = #tpu.pipeline_mode<synchronous>, transform_indices = @transform_3, window_bounds = array<i64: 8, 16>}, {pipeline_mode = #tpu.pipeline_mode<synchronous>, transform_indices = @transform_4, window_bounds = array<i64: 8, 1>}, {transform_indices = @transform_5, window_bounds = array<i64: 1, 8, 256>}]} {
    %c0 = arith.constant 0 : index
    %c0_0 = arith.constant 0 : index
    %c0_1 = arith.constant 0 : index
    %0 = vector.load %arg1[%c0, %c0_0, %c0_1] : memref<1x8x256xf32, #tpu.memory_space<vmem>>, vector<1x8x256xf32>
    %1 = vector.shape_cast %0 : vector<1x8x256xf32> to vector<8x256xf32>
    %c0_2 = arith.constant 0 : index
    %c0_3 = arith.constant 0 : index
    %2 = vector.load %arg2[%c0_2, %c0_3] : memref<48x8xf32, #tpu.memory_space<vmem>>, vector<48x8xf32>
    %cst = arith.constant dense<0.000000e+00> : vector<48x256xf32>
    %3 = tpu.matmul %2, %1, %cst {dimension_numbers = #tpu.dot_dimension_numbers<[1], [0], [0], [1], [0, 0, 1, 1], [], []>} : vector<48x8xf32>, vector<8x256xf32>, vector<48x256xf32> -> vector<48x256xf32>
    %c0_4 = arith.constant 0 : index
    %c0_5 = arith.constant 0 : index
    %4 = vector.load %arg3[%c0_4, %c0_5] : memref<48x1xf32, #tpu.memory_space<vmem>>, vector<48x1xf32>
    %5 = vector.broadcast %4 : vector<48x1xf32> to vector<48x256xf32>
    %6 = arith.addf %3, %5 : vector<48x256xf32>
    %7 = vector.extract_strided_slice %6 {offsets = [0, 0], sizes = [16, 256], strides = [1, 1]} : vector<48x256xf32> to vector<16x256xf32>
    %8 = vector.extract_strided_slice %6 {offsets = [16, 0], sizes = [16, 256], strides = [1, 1]} : vector<48x256xf32> to vector<16x256xf32>
    %9 = vector.extract_strided_slice %6 {offsets = [32, 0], sizes = [16, 256], strides = [1, 1]} : vector<48x256xf32> to vector<16x256xf32>
    %cst_6 = arith.constant dense<0.000000e+00> : vector<16x16xf32>
    %10 = tpu.matmul %8, %9, %cst_6 {dimension_numbers = #tpu.dot_dimension_numbers<[1], [1], [0], [0], [0, 0, 1, 0], [], []>} : vector<16x256xf32>, vector<16x256xf32>, vector<16x16xf32> -> vector<16x16xf32>
    %c0_7 = arith.constant 0 : index
    %c0_8 = arith.constant 0 : index
    %11 = vector.load %arg4[%c0_7, %c0_8] : memref<8x16xf32, #tpu.memory_space<vmem>>, vector<8x16xf32>
    %cst_9 = arith.constant dense<0.000000e+00> : vector<8x16xf32>
    %12 = tpu.matmul %11, %10, %cst_9 {dimension_numbers = #tpu.dot_dimension_numbers<[1], [1], [0], [0], [0, 0, 1, 0], [], []>} : vector<8x16xf32>, vector<16x16xf32>, vector<8x16xf32> -> vector<8x16xf32>
    %cst_10 = arith.constant dense<0.000000e+00> : vector<8x256xf32>
    %13 = tpu.matmul %12, %7, %cst_10 {dimension_numbers = #tpu.dot_dimension_numbers<[1], [0], [0], [1], [0, 0, 1, 1], [], []>} : vector<8x16xf32>, vector<16x256xf32>, vector<8x256xf32> -> vector<8x256xf32>
    %c0_11 = arith.constant 0 : index
    %c0_12 = arith.constant 0 : index
    %14 = vector.load %arg5[%c0_11, %c0_12] : memref<8x1xf32, #tpu.memory_space<vmem>>, vector<8x1xf32>
    %15 = vector.broadcast %14 : vector<8x1xf32> to vector<8x256xf32>
    %16 = arith.addf %13, %15 : vector<8x256xf32>
    %17 = arith.addf %1, %16 : vector<8x256xf32>
    %c0_13 = arith.constant 0 : index
    %c0_14 = arith.constant 0 : index
    %c0_15 = arith.constant 0 : index
    %18 = vector.load %arg6[%c0_13, %c0_14, %c0_15] : memref<1x8x256xf32, #tpu.memory_space<vmem>>, vector<1x8x256xf32>
    %19 = vector.shape_cast %18 : vector<1x8x256xf32> to vector<8x256xf32>
    %20 = vector.shape_cast %17 : vector<8x256xf32> to vector<1x8x256xf32>
    tpu.vector_store %arg6[%c0_13, %c0_14, %c0_15], %20 {strides = array<i32>} : memref<1x8x256xf32, #tpu.memory_space<vmem>>, vector<1x8x256xf32>,
    return
  }
  func.func @transform_0(%arg0: i32) -> (i32, i32, i32) {
    %c0_i32 = arith.constant 0 : i32
    %c0_i32_0 = arith.constant 0 : i32
    %c0_i32_1 = arith.constant 0 : i32
    return %arg0, %c0_i32, %c0_i32_0 : i32, i32, i32
  }
  func.func @transform_1(%arg0: i32) -> (i32, i32) {
    %c0_i32 = arith.constant 0 : i32
    %c0_i32_0 = arith.constant 0 : i32
    %c0_i32_1 = arith.constant 0 : i32
    return %c0_i32, %c0_i32_0 : i32, i32
  }
  func.func @transform_2(%arg0: i32) -> (i32, i32) {
    %c0_i32 = arith.constant 0 : i32
    %c0_i32_0 = arith.constant 0 : i32
    %c0_i32_1 = arith.constant 0 : i32
    return %c0_i32, %c0_i32_0 : i32, i32
  }
  func.func @transform_3(%arg0: i32) -> (i32, i32) {
    %c0_i32 = arith.constant 0 : i32
    %c0_i32_0 = arith.constant 0 : i32
    %c0_i32_1 = arith.constant 0 : i32
    return %c0_i32, %c0_i32_0 : i32, i32
  }
  func.func @transform_4(%arg0: i32) -> (i32, i32) {
    %c0_i32 = arith.constant 0 : i32
    %c0_i32_0 = arith.constant 0 : i32
    %c0_i32_1 = arith.constant 0 : i32
    return %c0_i32, %c0_i32_0 : i32, i32
  }
  func.func @transform_5(%arg0: i32) -> (i32, i32, i32) {
    %c0_i32 = arith.constant 0 : i32
    %c0_i32_0 = arith.constant 0 : i32
    %c0_i32_1 = arith.constant 0 : i32
    return %arg0, %c0_i32, %c0_i32_0 : i32, i32, i32
  }
}

</mosaic_0001>

<bundles_post_ra>
// kernel: tpu_custom_call.1
= control target key start
LH: loop header
LB: loop body
LE: loop exit
PB: predicated region body
PF: predicated region fallthrough
CT: control target
= control target key end

     0   :  { %10 = vsyncpa [#allocation3], 0  ;;  %s1055_s0 = inlined_call_operand.vmem [shape: f32[2,8,256], index: 0, kind: input, shape index: {}]   ;;  %s1056_s1 = inlined_call_operand.vmem [shape: f32[48,8], index: 1, kind: input, shape index: {}]   ;;  %s1057_s2 = inlined_call_operand.vmem [shape: f32[48,1], index: 2, kind: input, shape index: {}]   ;;  %s1058_s3 = inlined_call_operand.vmem [shape: f32[8,16], index: 3, kind: input, shape index: {}]   ;;  %s1059_s4 = inlined_call_operand.vmem [shape: f32[8,1], index: 4, kind: input, shape index: {}]   ;;  %s1060_s5 = inlined_call_operand.hbm [shape: f32[2,8,256], index: 5, kind: output, shape index: {}]  }
   0x1   :  { %12 = vsyncpa [#allocation3 + $0x1], 0  ;;  %s891_s18 = smov 0   ;;  %s893_s19 = smov 0  }
   0x2   :  { %s895_s20 = smov 0   ;;  %s897_s21 = smov 0  }
   0x3 LB: > { %s912_s22 = sadd.s32 4294967295, %s854_s21   ;;  %s701_s23 = sadd.s32 4294967294, %s854_s21   ;;  %s854_s21 = sphi %s897_s21, %s1066_s21   ;;  %s850_s20 = sphi %s895_s20, %s1065_s20   ;;  %s846_s19 = sphi %s893_s19, %s1064_s19   ;;  %s842_s18 = sphi %s891_s18, %s1063_s18  }
   0x4   : > { %s916_s24 = sadd.s32 1, %s854_s21   ;;  %s135_s25 = sadd.s32 1, %s850_s20 }
   0x5   : > { %s132_s26 = ssub.s32 %s854_s21, %s916_s24  ;;  %p145_p0 = scmp.ne.s32.totalorder %s850_s20, %s846_s19 }
   0x6   : > { %p133_p1 = scmp.eq.s32.totalorder %s132_s26, 0  ;;  %p146_p2 = scmp.eq.s32.totalorder %s912_s22, 1 }
   0x7   : > { %p151_p3 = scmp.ne.s32.totalorder %s846_s19, %s842_s18  ;;  %p152_p4 = scmp.eq.s32.totalorder %s701_s23, 1 }
   0x8   : > { %s927_s27 = scalar_select %p133_p1, %s850_s20, %s135_s25  }
   0x9   : > { %p929_p5 = por %p146_p2, %p145_p0  ;;  %p933_p6 = por %p152_p4, %p151_p3 }
   0xa   : > { %p704_p7 = scmp.ge.s32.totalorder %s854_s21, 1  ;;  %p190_p8 = scmp.lt.s32.totalorder %s854_s21, 3 }
   0xc   : > { %p191_p9 = pnand %p704_p7, %p190_p8 }
   0xd   : > { %p218_p10 = scmp.lt.s32.totalorder (!%p191_p9), %s912_s22, 1  ;;  %v856_v0 = vmov (!%p191_p9), 0.0   ;;  %v857_v1 = vmov (!%p191_p9), 0   ;;  %v235_v2 = vld [vmem:[%s1057_s2 + $0x20] sm:$0xff] (!%p191_p9)  ;;  %v233_v3 = vld [vmem:[%s1057_s2 + $0x10] sm:$0xff] (!%p191_p9)  ;;  %v236_v4 = vld [vmem:[%s1057_s2 + $0x28] sm:$0xff] (!%p191_p9) }
   0xe   : > { %194 = sbr.rel (%p191_p9) target bundleno = 941 (0x3ad), region = 40  ;;  %350 = vmatprep.mubr.f32.mxu0 (!%p191_p9), %v856_v0  ;;  %790 = vset.pattern.permute.xlu0 (!%p191_p9), %v857_v1  ;;  %v234_v5 = vld [vmem:[%s1057_s2 + $0x18] sm:$0xff] (!%p191_p9)  ;;  %v225_v8 = vld [vmem:[%s1056_s1] sm:$0xff] (!%p191_p9)  ;;  %vm267_vm0 = vcmask (!%p191_p9), 64512   ;;  %v232_v10 = vld [vmem:[%s1057_s2 + $0x8] sm:$0xff] (!%p191_p9)  ;;  %v858_v51 = vmov (!%p191_p9), 0.0|0.0  }
   0xf   : > { %791 = vset.pattern.permute.xlu1 (!%p191_p9), %v857_v1  ;;  %259 = vperm.xlu0 (!%p191_p9), %790, %v235_v2   ;;  %v231_v9 = vld [vmem:[%s1057_s2] sm:$0xff] (!%p191_p9)  ;;  %v226_v11 = vld [vmem:[%s1056_s1 + $0x8] sm:$0xff] (!%p191_p9)  ;;  %v227_v13 = vld [vmem:[%s1056_s1 + $0x10] sm:$0xff] (!%p191_p9)  ;;  %vm859_vm1 = vmmov (!%p191_p9), 0   ;;  %vm463_vm2 = vcmask (!%p191_p9), 130048   ;;  %s215_s6 = sand.u32 (!%p191_p9), 1, %s846_s19  }
  0x10   : > { %249 = vperm.xlu1 (!%p191_p9), %791, %v233_v3   ;;  %v543_v12 = vld [vmem:[%s1059_s4] sm:$0xff] (!%p191_p9)  ;;  %v228_v14 = vld [vmem:[%s1056_s1 + $0x18] sm:$0xff] (!%p191_p9)  ;;  %v230_v16 = vld [vmem:[%s1056_s1 + $0x28] sm:$0xff] (!%p191_p9)  ;;  %s705_s7 = sshll.u32 (!%p191_p9), %s215_s6, 4  ;;  %s724_s8 = sshll.u32 (!%p191_p9), %s912_s22, 8 }
  0x11   : > { %v229_v15 = vld [vmem:[%s1056_s1 + $0x20] sm:$0xff] (!%p191_p9)  ;;  %vm741_vm3 = vmpackc.low (!%p191_p9), %vm463_vm2, %vm463_vm2  ;;  %s217_s9 = scalar_lea.vmem (!%p191_p9), [#allocation2], %s705_s7  ;;  %s1013_s13 = scalar_lea.hbm (!%p191_p9), %s1060_s5, %s724_s8 }
  0x12   : > { %v462_v57 = vld [vmem:[%s1058_s3] sm:$0xff] (!%p191_p9) }
  0x13   : > { %264 = vperm.xlu0 (!%p191_p9), %790, %v236_v4  }
  0x14   : > { %254 = vperm.xlu1 (!%p191_p9), %791, %v234_v5  }
  0x15   : > { %s219_s30 = scalar_select %p218_p10, %s912_s22, 1 }
  0x16   : > { %s628_s22 = scalar_lea.sflag [#allocation3], %s215_s6 }
  0x17   : > { %s723_s10 = sshll.u32 %s219_s30, 4  ;;  %239 = vperm.xlu0 %790, %v231_v9  }
  0x18   : > { %s222_s15 = scalar_lea.vmem %s1055_s0, %s723_s10  ;;  %244 = vperm.xlu1 %791, %v232_v10   ;;  %s642_s10 = sshll.u32 %s217_s9, 4  ;;  %s1015_s10 = int_to_ptr.vmem [resolvable:$true] %s642_s10 }
  0x19   : > { %v957_v6 = vld [vmem:[%s222_s15 + $0x8] sm:$0xff]  ;;  %v959_v7 = vld [vmem:[%s222_s15] sm:$0xff]  ;;  %s792_s14 = scalar_lea.vmem %s1015_s10, 256  ;;  %s860_s15 = smov [#allocation2]  }
  0x1a   : > { %286 = vmatprep.subr.mxu0 %v957_v6  ;;  %p793_p11 = scmp.ne.s32.totalorder %s1015_s10, %s792_s14  ;;  %s796_s16 = sshll.u32 %s860_s15, 4  ;;  %s797_s16 = int_to_ptr.vmem [resolvable:$false] %s796_s16 }
  0x1b   : > { %287 = vmatpush1.msra.mxu0 %v959_v7  ;;  %546 = vperm.xlu0 %790, %v543_v12   ;;  %s798_s17 = scalar_lea.vmem %s797_s16, 512  ;;  %p799_p0 = scmp.lt.s32.totalorder %s1015_s10, %s797_s16 }
  0x1c   : > { %708 = vmatmul.mubr.msk.f32.vlgmr.msra.gmra.mrb[0].mxu0 %vm267_vm0, %v225_v8  ;;  %p794_p12 = pnand %p793_p11, %p929_p5  ;;  %p800_p1 = scmp.lt.s32.totalorder %s798_s17, %s792_s14 }
  0x1d   : > { %356 = vmatprep.mubr.f32.mxu0 %v856_v0 }
  0x1e   : > { %p795_p13 = pneg %p794_p12  ;;  %p801_p2 = por %p800_p1, %p799_p0 }
  0x20   : > { %709 = vmatmul.mubr.msk.f32.gmra.mrb[2].mxu0 %vm267_vm0, %v226_v11  ;;  %p802_p3 = pnand %p801_p2, %p795_p13 }
  0x21   : > { %362 = vmatprep.mubr.f32.mxu0 %v856_v0 }
  0x24   : > { %710 = vmatmul.mubr.msk.f32.gmra.mrb[4].mxu0 %vm267_vm0, %v227_v13 }
  0x25   : > { %368 = vmatprep.mubr.f32.mxu0 %v856_v0 }
  0x28   : > { %711 = vmatmul.mubr.msk.f32.gmra.mrb[6].mxu0 %vm267_vm0, %v228_v14 }
  0x29   : > { %374 = vmatprep.mubr.f32.mxu0 %v856_v0 }
  0x2c   : > { %712 = vmatmul.mubr.msk.f32.gmra.mrb[8].mxu0 %vm267_vm0, %v229_v15 }
  0x2d   : > { %380 = vmatprep.mubr.f32.mxu0 %v856_v0 }
  0x30   : > { %713 = vmatmul.mubr.msk.f32.gmra.mrb[10].mxu0 %vm267_vm0, %v230_v16 }
  0x8e   : > { %v260_v17 = vpop.permute.xlu0 %259 }
  0x8f   : > { %v250_v18 = vpop.permute.xlu1 %249 }
  0x92   : > { %v265_v19 = vpop.permute.xlu0 %264 }
  0x93   : > { %v255_v20 = vpop.permute.xlu1 %254 }
  0x96   : > { %v240_v23 = vpop.permute.xlu0 %239 }
  0x97   : > { %v245_v24 = vpop.permute.xlu1 %244 }
  0x9a   : > { %v547_v60 = vpop.permute.xlu0 %546 }
  0xef   : > { %v352_v21 = vpop.f32.mrb[0].mxu0 }
  0xf0   : > { %v354_v22 = vpop.f32.mrb[1].mxu0  ;;  %v353_v26 = vadd.f32 %v352_v21, %v240_v23 }
  0xf1   : > { %v355_v29 = vadd.f32 %v354_v22, %v240_v23 }
  0xf3   : > { %v358_v25 = vpop.f32.mrb[2].mxu0 }
  0xf4   : > { %v359_v27 = vadd.f32 %v358_v25, %v245_v24  ;;  %v360_v28 = vpop.f32.mrb[3].mxu0 }
  0xf5   : > { %v361_v30 = vadd.f32 %v360_v28, %v245_v24 }
  0xf6   : > { %v745_v31 = vpack.c.bf16 %v359_v27, %v353_v26 }
  0xf7   : > { %v743_v32 = vpack.c.bf16 %v361_v30, %v355_v29  ;;  %v364_v33 = vpop.f32.mrb[4].mxu0 }
  0xf8   : > { %v366_v34 = vpop.f32.mrb[5].mxu0  ;;  %v365_v48 = vadd.f32 %v364_v33, %v250_v18 }
  0xf9   : > { %v367_v35 = vadd.f32 %v366_v34, %v250_v18 }
  0xfb   : > { %v370_v36 = vpop.f32.mrb[6].mxu0  ;;  %451 = vmatprep.mubr.f32.mxu1 %v367_v35 }
  0xfc   : > { %v372_v37 = vpop.f32.mrb[7].mxu0  ;;  %v371_v50 = vadd.f32 %v370_v36, %v255_v20 }
  0xfd   : > { %v373_v49 = vadd.f32 %v372_v37, %v255_v20 }
  0xff   : > { %v376_v38 = vpop.f32.mrb[8].mxu0 }
 0x100   : > { %v378_v39 = vpop.f32.mrb[9].mxu0  ;;  %v377_v41 = vadd.f32 %v376_v38, %v260_v17 }
 0x101   : > { %v379_v44 = vadd.f32 %v378_v39, %v260_v17 }
 0x103   : > { %v382_v40 = vpop.f32.mrb[10].mxu0 }
 0x104   : > { %v383_v42 = vadd.f32 %v382_v40, %v265_v19  ;;  %v384_v43 = vpop.f32.mrb[11].mxu0 }
 0x105   : > { %v385_v45 = vadd.f32 %v384_v43, %v265_v19 }
 0x106   : > { %v737_v46 = vpack.c.bf16 %v383_v42, %v377_v41 }
 0x107   : > { %v735_v47 = vpack.c.bf16 %v385_v45, %v379_v44 }
 0x109   : > { %736 = vmatprep.subr.bf16.mxu1 %v735_v47 }
 0x10a   : > { %738 = vmatpush1.bf16.xpose.msra.mxu1 %v737_v46 }
 0x10b   : > { %739 = vmatprep.subr.bf16.mxu1 %v858_v51 }
 0x111   : > { %452 = vmatmul.mubr.f32.vlgmr.msra.gmra.mrb[0].mxu1 %v365_v48 }
 0x112   : > { %456 = vmatprep.mubr.f32.mxu1 %v373_v49 }
 0x115   : > { %457 = vmatmul.mubr.f32.gmra.mrb[2].mxu1 %v371_v50 }
 0x116   : > { %732 = vmatprep.mubr.msk.f32.mxu1 %vm859_vm1, %v856_v0 }
 0x1e4   : > { %v453_v52 = vpop.f32.mrb[0].mxu1 }
 0x1e5   : > { %v455_v53 = vpop.f32.mrb[1].mxu1 }
 0x1e8   : > { %v458_v54 = vpop.f32.mrb[2].mxu1 }
 0x1e9   : > { %v740_v55 = vpack.c.bf16 %v458_v54, %v453_v52  ;;  %v460_v56 = vpop.f32.mrb[3].mxu1 }
 0x1eb   : > { %742 = vmatpush3.bf16.xpose.msk.msra.mxu1 %vm741_vm3, %v740_v55 }
 0x1ec   : > { %744 = vmatprep.subr.bf16.mxu1 %v743_v32 }
 0x1f2   : > { %733 = vmatmul.mubr.msk.f32.vlgmr.msra.gmra.mrb[4].mxu1 %vm463_vm2, %v462_v57 }
 0x1f3   : > { %746 = vmatpush1.bf16.msra.mxu1 %v745_v31  ;;  %616 = vmatprep.mubr.f32.mxu1 %v856_v0 }
 0x2c5   : > { %v539_v58 = vpop.f32.mrb[4].mxu1 }
 0x2c6   : > { %v734_v59 = vpop.f32.mrb[5].mxu1  ;;  %717 = vmatmul.mubr.msk.f32.vlgmr.msra.gmra.mrb[6].mxu1 %vm463_vm2, %v539_v58 }
 0x399   : > { %v618_v61 = vpop.f32.mrb[6].mxu1 }
 0x39a   : > { %v619_v62 = vadd.f32 %v618_v61, %v547_v60  ;;  %v620_v63 = vpop.f32.mrb[7].mxu1 }
 0x39b   : > { %v621_v1 = vadd.f32 %v620_v63, %v547_v60 }
 0x39c   : > { %v623_v2 = vadd.f32 %v619_v62, %v959_v7 }
 0x39d   : > { %v624_v3 = vadd.f32 %v621_v1, %v957_v6 }
 0x39e   : > { %625 = vst [vmem:[%s217_s9] sm:$0xff] %v623_v2 }
 0x39f   : > { %626 = vst [vmem:[%s217_s9 + $0x8] sm:$0xff] %v624_v3 }
 0x3a0   : > { %805 = shalt.err (!%p802_p3)
}
 0x3a1   : > { %s806_s23 = scalar_lea.hbm %s1013_s13, 256  ;;  %s810_s30 = scalar_lea.hbm %s1060_s5, 512 }
 0x3a2   : > { %p807_p4 = scmp.ne.s32.totalorder %s1013_s13, %s806_s23  ;;  %p811_p9 = scmp.lt.u32.totalorder %s1013_s13, %s1060_s5 }
 0x3a3   : > { %p812_p10 = scmp.lt.u32.totalorder %s810_s30, %s806_s23  ;;  %p814_p12 = scmp.lt.u32.totalorder %s806_s23, %s1013_s13 }
 0x3a4   : > { %p808_p7 = pnand %p807_p4, %p929_p5 }
 0x3a5   : > { %p813_p11 = por %p812_p10, %p811_p9 }
 0x3a6   : > { %p809_p8 = pneg %p808_p7 }
 0x3a7   : > { %p815_p13 = por %p814_p12, %p813_p11 }
 0x3a9   : > { %p816_p0 = pnand %p815_p13, %p809_p8 }
 0x3ab   : > { %819 = shalt.err (!%p816_p0)
}
 0x3ac   : > { %747 = dma.vmem_to_hbm [thread:$0]  (%p929_p5), %s1015_s10, 256, %s1013_s13, %s628_s22  }
 0x3ad PF: > { %p753_p1 = scmp.ge.s32.totalorder %s854_s21, 2  ;;  %s654_s8 = sand.u32 1, %s842_s18  }
 0x3ae   : > { %s655_s9 = scalar_lea.sflag [#allocation3], %s654_s8 }
 0x3af   : > { %p750_p2 = pnand %p753_p1, %p933_p6 }
 0x3b1   : > { %837 = dma.done.wait (!%p750_p2), %s655_s9, 256  }
 0x3b2   : > { %839 = vsyncadd (!%p750_p2), %s655_s9, 4294967040  ;;  %p15_p3 = scmp.ge.s32.totalorder %s916_s24, 4   ;;  %s1063_s18 = smov %s846_s19 }
 0x3b3   : > { %s1064_s19 = smov %s850_s20  ;;  %s1065_s20 = smov %s927_s27 }
 0x3b4   : > { %s1066_s21 = smov %s916_s24  ;;  %17 = sbr.rel (!%p15_p3) target bundleno = 3 (0x3), region = 75 }
 0x3bb   :  { %660 = vsyncpa [#allocation3], 1 }
 0x3bc   :  { %662 = vsyncpa [#allocation3 + $0x1], 1 }

// kernel: tpu_custom_call.1
= control target key start
LH: loop header
LB: loop body
LE: loop exit
PB: predicated region body
PF: predicated region fallthrough
CT: control target
= control target key end

     0   :  { %10 = vsyncpa [#allocation3], 0  ;;  %s1055_s0 = inlined_call_operand.vmem [shape: f32[2,8,256], index: 0, kind: input, shape index: {}]   ;;  %s1056_s1 = inlined_call_operand.vmem [shape: f32[48,8], index: 1, kind: input, shape index: {}]   ;;  %s1057_s2 = inlined_call_operand.vmem [shape: f32[48,1], index: 2, kind: input, shape index: {}]   ;;  %s1058_s3 = inlined_call_operand.vmem [shape: f32[8,16], index: 3, kind: input, shape index: {}]   ;;  %s1059_s4 = inlined_call_operand.vmem [shape: f32[8,1], index: 4, kind: input, shape index: {}]   ;;  %s1060_s5 = inlined_call_operand.hbm [shape: f32[2,8,256], index: 5, kind: output, shape index: {}]  }
   0x1   :  { %12 = vsyncpa [#allocation3 + $0x1], 0  ;;  %s891_s18 = smov 0   ;;  %s893_s19 = smov 0  }
   0x2   :  { %s895_s20 = smov 0   ;;  %s897_s21 = smov 0  }
   0x3 LB: > { %s912_s22 = sadd.s32 4294967295, %s854_s21   ;;  %s701_s23 = sadd.s32 4294967294, %s854_s21   ;;  %s854_s21 = sphi %s897_s21, %s1066_s21   ;;  %s850_s20 = sphi %s895_s20, %s1065_s20   ;;  %s846_s19 = sphi %s893_s19, %s1064_s19   ;;  %s842_s18 = sphi %s891_s18, %s1063_s18  }
   0x4   : > { %s916_s24 = sadd.s32 1, %s854_s21   ;;  %s135_s25 = sadd.s32 1, %s850_s20 }
   0x5   : > { %s132_s26 = ssub.s32 %s854_s21, %s916_s24  ;;  %p145_p0 = scmp.ne.s32.totalorder %s850_s20, %s846_s19 }
   0x6   : > { %p133_p1 = scmp.eq.s32.totalorder %s132_s26, 0  ;;  %p146_p2 = scmp.eq.s32.totalorder %s912_s22, 1 }
   0x7   : > { %p151_p3 = scmp.ne.s32.totalorder %s846_s19, %s842_s18  ;;  %p152_p4 = scmp.eq.s32.totalorder %s701_s23, 1 }
   0x8   : > { %s927_s27 = scalar_select %p133_p1, %s850_s20, %s135_s25  }
   0x9   : > { %p929_p5 = por %p146_p2, %p145_p0  ;;  %p933_p6 = por %p152_p4, %p151_p3 }
   0xa   : > { %p704_p7 = scmp.ge.s32.totalorder %s854_s21, 1  ;;  %p190_p8 = scmp.lt.s32.totalorder %s854_s21, 3 }
   0xc   : > { %p191_p9 = pnand %p704_p7, %p190_p8 }
   0xd   : > { %p218_p10 = scmp.lt.s32.totalorder (!%p191_p9), %s912_s22, 1  ;;  %v856_v0 = vmov (!%p191_p9), 0.0   ;;  %v857_v1 = vmov (!%p191_p9), 0   ;;  %v235_v2 = vld [vmem:[%s1057_s2 + $0x20] sm:$0xff] (!%p191_p9)  ;;  %v233_v3 = vld [vmem:[%s1057_s2 + $0x10] sm:$0xff] (!%p191_p9)  ;;  %v236_v4 = vld [vmem:[%s1057_s2 + $0x28] sm:$0xff] (!%p191_p9) }
   0xe   : > { %194 = sbr.rel (%p191_p9) target bundleno = 941 (0x3ad), region = 40  ;;  %350 = vmatprep.mubr.f32.mxu0 (!%p191_p9), %v856_v0  ;;  %790 = vset.pattern.permute.xlu0 (!%p191_p9), %v857_v1  ;;  %v234_v5 = vld [vmem:[%s1057_s2 + $0x18] sm:$0xff] (!%p191_p9)  ;;  %v225_v8 = vld [vmem:[%s1056_s1] sm:$0xff] (!%p191_p9)  ;;  %vm267_vm0 = vcmask (!%p191_p9), 64512   ;;  %v232_v10 = vld [vmem:[%s1057_s2 + $0x8] sm:$0xff] (!%p191_p9)  ;;  %v858_v51 = vmov (!%p191_p9), 0.0|0.0  }
   0xf   : > { %791 = vset.pattern.permute.xlu1 (!%p191_p9), %v857_v1  ;;  %259 = vperm.xlu0 (!%p191_p9), %790, %v235_v2   ;;  %v231_v9 = vld [vmem:[%s1057_s2] sm:$0xff] (!%p191_p9)  ;;  %v226_v11 = vld [vmem:[%s1056_s1 + $0x8] sm:$0xff] (!%p191_p9)  ;;  %v227_v13 = vld [vmem:[%s1056_s1 + $0x10] sm:$0xff] (!%p191_p9)  ;;  %vm859_vm1 = vmmov (!%p191_p9), 0   ;;  %vm463_vm2 = vcmask (!%p191_p9), 130048   ;;  %s215_s6 = sand.u32 (!%p191_p9), 1, %s846_s19  }
  0x10   : > { %249 = vperm.xlu1 (!%p191_p9), %791, %v233_v3   ;;  %v543_v12 = vld [vmem:[%s1059_s4] sm:$0xff] (!%p191_p9)  ;;  %v228_v14 = vld [vmem:[%s1056_s1 + $0x18] sm:$0xff] (!%p191_p9)  ;;  %v230_v16 = vld [vmem:[%s1056_s1 + $0x28] sm:$0xff] (!%p191_p9)  ;;  %s705_s7 = sshll.u32 (!%p191_p9), %s215_s6, 4  ;;  %s724_s8 = sshll.u32 (!%p191_p9), %s912_s22, 8 }
  0x11   : > { %v229_v15 = vld [vmem:[%s1056_s1 + $0x20] sm:$0xff] (!%p191_p9)  ;;  %vm741_vm3 = vmpackc.low (!%p191_p9), %vm463_vm2, %vm463_vm2  ;;  %s217_s9 = scalar_lea.vmem (!%p191_p9), [#allocation2], %s705_s7  ;;  %s1013_s13 = scalar_lea.hbm (!%p191_p9), %s1060_s5, %s724_s8 }
  0x12   : > { %v462_v57 = vld [vmem:[%s1058_s3] sm:$0xff] (!%p191_p9) }
  0x13   : > { %264 = vperm.xlu0 (!%p191_p9), %790, %v236_v4  }
  0x14   : > { %254 = vperm.xlu1 (!%p191_p9), %791, %v234_v5  }
  0x15   : > { %s219_s30 = scalar_select %p218_p10, %s912_s22, 1 }
  0x16   : > { %s628_s22 = scalar_lea.sflag [#allocation3], %s215_s6 }
  0x17   : > { %s723_s10 = sshll.u32 %s219_s30, 4  ;;  %239 = vperm.xlu0 %790, %v231_v9  }
  0x18   : > { %s222_s15 = scalar_lea.vmem %s1055_s0, %s723_s10  ;;  %244 = vperm.xlu1 %791, %v232_v10   ;;  %s642_s10 = sshll.u32 %s217_s9, 4  ;;  %s1015_s10 = int_to_ptr.vmem [resolvable:$true] %s642_s10 }
  0x19   : > { %v957_v6 = vld [vmem:[%s222_s15 + $0x8] sm:$0xff]  ;;  %v959_v7 = vld [vmem:[%s222_s15] sm:$0xff]  ;;  %s792_s14 = scalar_lea.vmem %s1015_s10, 256  ;;  %s860_s15 = smov [#allocation2]  }
  0x1a   : > { %286 = vmatprep.subr.mxu0 %v957_v6  ;;  %p793_p11 = scmp.ne.s32.totalorder %s1015_s10, %s792_s14  ;;  %s796_s16 = sshll.u32 %s860_s15, 4  ;;  %s797_s16 = int_to_ptr.vmem [resolvable:$false] %s796_s16 }
  0x1b   : > { %287 = vmatpush1.msra.mxu0 %v959_v7  ;;  %546 = vperm.xlu0 %790, %v543_v12   ;;  %s798_s17 = scalar_lea.vmem %s797_s16, 512  ;;  %p799_p0 = scmp.lt.s32.totalorder %s1015_s10, %s797_s16 }
  0x1c   : > { %708 = vmatmul.mubr.msk.f32.vlgmr.msra.gmra.mrb[0].mxu0 %vm267_vm0, %v225_v8  ;;  %p794_p12 = pnand %p793_p11, %p929_p5  ;;  %p800_p1 = scmp.lt.s32.totalorder %s798_s17, %s792_s14 }
  0x1d   : > { %356 = vmatprep.mubr.f32.mxu0 %v856_v0 }
  0x1e   : > { %p795_p13 = pneg %p794_p12  ;;  %p801_p2 = por %p800_p1, %p799_p0 }
  0x20   : > { %709 = vmatmul.mubr.msk.f32.gmra.mrb[2].mxu0 %vm267_vm0, %v226_v11  ;;  %p802_p3 = pnand %p801_p2, %p795_p13 }
  0x21   : > { %362 = vmatprep.mubr.f32.mxu0 %v856_v0 }
  0x24   : > { %710 = vmatmul.mubr.msk.f32.gmra.mrb[4].mxu0 %vm267_vm0, %v227_v13 }
  0x25   : > { %368 = vmatprep.mubr.f32.mxu0 %v856_v0 }
  0x28   : > { %711 = vmatmul.mubr.msk.f32.gmra.mrb[6].mxu0 %vm267_vm0, %v228_v14 }
  0x29   : > { %374 = vmatprep.mubr.f32.mxu0 %v856_v0 }
  0x2c   : > { %712 = vmatmul.mubr.msk.f32.gmra.mrb[8].mxu0 %vm267_vm0, %v229_v15 }
  0x2d   : > { %380 = vmatprep.mubr.f32.mxu0 %v856_v0 }
  0x30   : > { %713 = vmatmul.mubr.msk.f32.gmra.mrb[10].mxu0 %vm267_vm0, %v230_v16 }
  0x8e   : > { %v260_v17 = vpop.permute.xlu0 %259 }
  0x8f   : > { %v250_v18 = vpop.permute.xlu1 %249 }
  0x92   : > { %v265_v19 = vpop.permute.xlu0 %264 }
  0x93   : > { %v255_v20 = vpop.permute.xlu1 %254 }
  0x96   : > { %v240_v23 = vpop.permute.xlu0 %239 }
  0x97   : > { %v245_v24 = vpop.permute.xlu1 %244 }
  0x9a   : > { %v547_v60 = vpop.permute.xlu0 %546 }
  0xef   : > { %v352_v21 = vpop.f32.mrb[0].mxu0 }
  0xf0   : > { %v354_v22 = vpop.f32.mrb[1].mxu0  ;;  %v353_v26 = vadd.f32 %v352_v21, %v240_v23 }
  0xf1   : > { %v355_v29 = vadd.f32 %v354_v22, %v240_v23 }
  0xf3   : > { %v358_v25 = vpop.f32.mrb[2].mxu0 }
  0xf4   : > { %v359_v27 = vadd.f32 %v358_v25, %v245_v24  ;;  %v360_v28 = vpop.f32.mrb[3].mxu0 }
  0xf5   : > { %v361_v30 = vadd.f32 %v360_v28, %v245_v24 }
  0xf6   : > { %v745_v31 = vpack.c.bf16 %v359_v27, %v353_v26 }
  0xf7   : > { %v743_v32 = vpack.c.bf16 %v361_v30, %v355_v29  ;;  %v364_v33 = vpop.f32.mrb[4].mxu0 }
  0xf8   : > { %v366_v34 = vpop.f32.mrb[5].mxu0  ;;  %v365_v48 = vadd.f32 %v364_v33, %v250_v18 }
  0xf9   : > { %v367_v35 = vadd.f32 %v366_v34, %v250_v18 }
  0xfb   : > { %v370_v36 = vpop.f32.mrb[6].mxu0  ;;  %451 = vmatprep.mubr.f32.mxu1 %v367_v35 }
  0xfc   : > { %v372_v37 = vpop.f32.mrb[7].mxu0  ;;  %v371_v50 = vadd.f32 %v370_v36, %v255_v20 }
  0xfd   : > { %v373_v49 = vadd.f32 %v372_v37, %v255_v20 }
  0xff   : > { %v376_v38 = vpop.f32.mrb[8].mxu0 }
 0x100   : > { %v378_v39 = vpop.f32.mrb[9].mxu0  ;;  %v377_v41 = vadd.f32 %v376_v38, %v260_v17 }
 0x101   : > { %v379_v44 = vadd.f32 %v378_v39, %v260_v17 }
 0x103   : > { %v382_v40 = vpop.f32.mrb[10].mxu0 }
 0x104   : > { %v383_v42 = vadd.f32 %v382_v40, %v265_v19  ;;  %v384_v43 = vpop.f32.mrb[11].mxu0 }
 0x105   : > { %v385_v45 = vadd.f32 %v384_v43, %v265_v19 }
 0x106   : > { %v737_v46 = vpack.c.bf16 %v383_v42, %v377_v41 }
 0x107   : > { %v735_v47 = vpack.c.bf16 %v385_v45, %v379_v44 }
 0x109   : > { %736 = vmatprep.subr.bf16.mxu1 %v735_v47 }
 0x10a   : > { %738 = vmatpush1.bf16.xpose.msra.mxu1 %v737_v46 }
 0x10b   : > { %739 = vmatprep.subr.bf16.mxu1 %v858_v51 }
 0x111   : > { %452 = vmatmul.mubr.f32.vlgmr.msra.gmra.mrb[0].mxu1 %v365_v48 }
 0x112   : > { %456 = vmatprep.mubr.f32.mxu1 %v373_v49 }
 0x115   : > { %457 = vmatmul.mubr.f32.gmra.mrb[2].mxu1 %v371_v50 }
 0x116   : > { %732 = vmatprep.mubr.msk.f32.mxu1 %vm859_vm1, %v856_v0 }
 0x1e4   : > { %v453_v52 = vpop.f32.mrb[0].mxu1 }
 0x1e5   : > { %v455_v53 = vpop.f32.mrb[1].mxu1 }
 0x1e8   : > { %v458_v54 = vpop.f32.mrb[2].mxu1 }
 0x1e9   : > { %v740_v55 = vpack.c.bf16 %v458_v54, %v453_v52  ;;  %v460_v56 = vpop.f32.mrb[3].mxu1 }
 0x1eb   : > { %742 = vmatpush3.bf16.xpose.msk.msra.mxu1 %vm741_vm3, %v740_v55 }
 0x1ec   : > { %744 = vmatprep.subr.bf16.mxu1 %v743_v32 }
 0x1f2   : > { %733 = vmatmul.mubr.msk.f32.vlgmr.msra.gmra.mrb[4].mxu1 %vm463_vm2, %v462_v57 }
 0x1f3   : > { %746 = vmatpush1.bf16.msra.mxu1 %v745_v31  ;;  %616 = vmatprep.mubr.f32.mxu1 %v856_v0 }
 0x2c5   : > { %v539_v58 = vpop.f32.mrb[4].mxu1 }
 0x2c6   : > { %v734_v59 = vpop.f32.mrb[5].mxu1  ;;  %717 = vmatmul.mubr.msk.f32.vlgmr.msra.gmra.mrb[6].mxu1 %vm463_vm2, %v539_v58 }
 0x399   : > { %v618_v61 = vpop.f32.mrb[6].mxu1 }
 0x39a   : > { %v619_v62 = vadd.f32 %v618_v61, %v547_v60  ;;  %v620_v63 = vpop.f32.mrb[7].mxu1 }
 0x39b   : > { %v621_v1 = vadd.f32 %v620_v63, %v547_v60 }
 0x39c   : > { %v623_v2 = vadd.f32 %v619_v62, %v959_v7 }
 0x39d   : > { %v624_v3 = vadd.f32 %v621_v1, %v957_v6 }
 0x39e   : > { %625 = vst [vmem:[%s217_s9] sm:$0xff] %v623_v2 }
 0x39f   : > { %626 = vst [vmem:[%s217_s9 + $0x8] sm:$0xff] %v624_v3 }
 0x3a0   : > { %805 = shalt.err (!%p802_p3)
}
 0x3a1   : > { %s806_s23 = scalar_lea.hbm %s1013_s13, 256  ;;  %s810_s30 = scalar_lea.hbm %s1060_s5, 512 }
 0x3a2   : > { %p807_p4 = scmp.ne.s32.totalorder %s1013_s13, %s806_s23  ;;  %p811_p9 = scmp.lt.u32.totalorder %s1013_s13, %s1060_s5 }
 0x3a3   : > { %p812_p10 = scmp.lt.u32.totalorder %s810_s30, %s806_s23  ;;  %p814_p12 = scmp.lt.u32.totalorder %s806_s23, %s1013_s13 }
 0x3a4   : > { %p808_p7 = pnand %p807_p4, %p929_p5 }
 0x3a5   : > { %p813_p11 = por %p812_p10, %p811_p9 }
 0x3a6   : > { %p809_p8 = pneg %p808_p7 }
 0x3a7   : > { %p815_p13 = por %p814_p12, %p813_p11 }
 0x3a9   : > { %p816_p0 = pnand %p815_p13, %p809_p8 }
 0x3ab   : > { %819 = shalt.err (!%p816_p0)
}
 0x3ac   : > { %747 = dma.vmem_to_hbm [thread:$0]  (%p929_p5), %s1015_s10, 256, %s1013_s13, %s628_s22  }
 0x3ad PF: > { %p753_p1 = scmp.ge.s32.totalorder %s854_s21, 2  ;;  %s654_s8 = sand.u32 1, %s842_s18  }
 0x3ae   : > { %s655_s9 = scalar_lea.sflag [#allocation3], %s654_s8 }
 0x3af   : > { %p750_p2 = pnand %p753_p1, %p933_p6 }
 0x3b1   : > { %837 = dma.done.wait (!%p750_p2), %s655_s9, 256  }
 0x3b2   : > { %839 = vsyncadd (!%p750_p2), %s655_s9, 4294967040  ;;  %p15_p3 = scmp.ge.s32.totalorder %s916_s24, 4   ;;  %s1063_s18 = smov %s846_s19 }
 0x3b3   : > { %s1064_s19 = smov %s850_s20  ;;  %s1065_s20 = smov %s927_s27 }
 0x3b4   : > { %s1066_s21 = smov %s916_s24  ;;  %17 = sbr.rel (!%p15_p3) target bundleno = 3 (0x3), region = 75 }
 0x3bb   :  { %660 = vsyncpa [#allocation3], 1 }
 0x3bc   :  { %662 = vsyncpa [#allocation3 + $0x1], 1 }

</bundles_post_ra>
